<compile_context>
chip_gen: v7x
topology: tpu7x:2x2x1
jax: 0.10.0
libtpu: 0.0.40
codegen_flags: <defaults>
</compile_context>

<pallas_src>
import functools

import jax
import jax.numpy as jnp
from jax import lax
from jax.experimental import pallas as pl
from jax.experimental.pallas import tpu as pltpu


def _dsnet_kernel(x_ref, wtap_ref, pwb_ref, out_ref, *, W, K):
    """Fused depthwise(KxK, 'same') + pointwise(1x1) conv, batch fused.

    x_ref:    (B*Cin,  H*W)        activations (sublane = image*channel,
                                    lane = flattened spatial)
    wtap_ref: (K*K, B*Cin, H*W)    per-tap weights with border masks folded in
    pwb_ref:  (B*Cout, B*Cin)      block-diagonal pointwise weight
    out_ref:  (B*Cout, H*W)
    """
    hw = x_ref.shape[1]
    pad = (K - 1) // 2
    t_center = pad * K + pad

    # One full-vreg load for the whole batch; cast after the DMA so the
    # VPU math stays f32 on every generation.
    xb = x_ref[...].astype(jnp.float32)

    # Depthwise KxK: per tap, an XLU lane-roll plus one broadcast-free VPU
    # MAC against the precomputed masked weight plane.  Seed the accumulator
    # with the center tap (no roll, no add-to-zero).
    d = xb * wtap_ref[t_center].astype(jnp.float32)
    for ki in range(K):
        for kj in range(K):
            t = ki * K + kj
            if t == t_center:
                continue
            off = (ki - pad) * W + (kj - pad)
            shifted = xb if off == 0 else pltpu.roll(xb, (-off) % hw, axis=1)
            d = d + shifted * wtap_ref[t].astype(jnp.float32)

    # Pointwise 1x1: one tiny block-diagonal MXU dot for the whole batch
    # (B*Cout, B*Cin) @ (B*Cin, H*W) -> (B*Cout, H*W); VALU/XLU stay free.
    o = jnp.dot(pwb_ref[...].astype(jnp.float32), d,
                preferred_element_type=jnp.float32)

    # Lane-dense, unmasked full-vreg store.
    out_ref[...] = o.astype(out_ref.dtype)


def dsnet_forward(x, dw_weight, pw_weight, *, padding=1):
    """x: (B, Cin, H, W) NCHW. dw_weight: (Cin, 1, K, K). pw_weight: (Cout, Cin, 1, 1)."""
    b, cin, h, w = x.shape
    k = dw_weight.shape[-1]
    cout = pw_weight.shape[0]
    if padding != (k - 1) // 2:
        # TODO(synk): only 'same' convs (padding == (K-1)//2) are supported.
        raise ValueError("dsnet_forward assumes padding == (K - 1) // 2")

    hw = h * w

    # Free reshape: (B, Cin, H, W) -> (B*Cin, H*W); no jnp.pad pre-pass.
    xf = x.reshape(b * cin, hw)

    # Masked per-tap weight planes, built once in the wrapper so the kernel
    # has no border handling at all: plane[t, b*Cin+ci, r*W+c] =
    #   dw[ci, t] if (r + di, c + dj) is in bounds else 0.
    lin = jnp.arange(hw, dtype=jnp.int32)
    row = lin // w
    col = lin % w
    dw = dw_weight.reshape(cin, k * k).astype(x.dtype)       # (Cin, K*K)
    planes = []
    for ki in range(k):
        for kj in range(k):
            di, dj = ki - padding, kj - padding
            mask = ((row + di >= 0) & (row + di < h) &
                    (col + dj >= 0) & (col + dj < w)).astype(x.dtype)   # (HW,)
            planes.append(dw[:, ki * k + kj][:, None] * mask[None, :])  # (Cin, HW)
    wtap = jnp.stack(planes, axis=0)            # (K*K, Cin, HW)
    wtap = jnp.tile(wtap, (1, b, 1))            # (K*K, B*Cin, HW), rows = b*Cin+ci

    # Block-diagonal pointwise weight so one MXU dot handles every image.
    pw2 = pw_weight.reshape(cout, cin).astype(x.dtype)
    pwb = jnp.kron(jnp.eye(b, dtype=pw2.dtype), pw2)         # (B*Cout, B*Cin)

    kernel = functools.partial(_dsnet_kernel, W=w, K=k)
    out_flat = pl.pallas_call(
        kernel,
        out_shape=jax.ShapeDtypeStruct((b * cout, hw), x.dtype),
        grid_spec=pltpu.PrefetchScalarGridSpec(
            num_scalar_prefetch=0,
            grid=(1,),  # whole batch fused in one step: no per-step overhead
            in_specs=[
                pl.BlockSpec((b * cin, hw), lambda i: (0, 0)),
                pl.BlockSpec((k * k, b * cin, hw), lambda i: (0, 0, 0)),
                pl.BlockSpec((b * cout, b * cin), lambda i: (0, 0)),
            ],
            out_specs=pl.BlockSpec((b * cout, hw), lambda i: (0, 0)),
        ),
        compiler_params=pltpu.CompilerParams(
            dimension_semantics=("arbitrary",)),
    )(xf, wtap, pwb)

    # Free reshape back to NCHW: row index b*Cout + co -> (b, co).
    return out_flat.reshape(b, cout, h, w)


def dsnet_reference(x, dw_weight, pw_weight, *, padding=1):
    """Pure-JAX reference (matches PyTorch Conv2d semantics, bias=False)."""
    cin = x.shape[1]
    dn = lax.conv_dimension_numbers(x.shape, dw_weight.shape,
                                    ("NCHW", "OIHW", "NCHW"))
    out = lax.conv_general_dilated(
        x, dw_weight, window_strides=(1, 1),
        padding=[(padding, padding), (padding, padding)],
        dimension_numbers=dn, feature_group_count=cin)
    dn2 = lax.conv_dimension_numbers(out.shape, pw_weight.shape,
                                     ("NCHW", "OIHW", "NCHW"))
    out = lax.conv_general_dilated(
        out, pw_weight, window_strides=(1, 1), padding=[(0, 0), (0, 0)],
        dimension_numbers=dn2)
    return out


if __name__ == "__main__":
    # Small shapes consistent with the module: batch=2, nin=4, nout=8, 16x16.
    B, NIN, NOUT, H, W, K, PAD = 2, 4, 8, 16, 16, 3, 1

    key = jax.random.PRNGKey(0)
    kx, kdw, kpw = jax.random.split(key, 3)

    x = jax.random.normal(kx, (B, NIN, H, W), dtype=jnp.float32)
    # nn.Conv2d weight shapes: depthwise (nin, 1, K, K) with groups=nin,
    # pointwise (nout, nin, 1, 1); bias=False.
    dw_weight = 0.1 * jax.random.normal(kdw, (NIN, 1, K, K), dtype=jnp.float32)
    pw_weight = 0.1 * jax.random.normal(kpw, (NOUT, NIN, 1, 1), dtype=jnp.float32)

    out = dsnet_forward(x, dw_weight, pw_weight, padding=PAD)
    out = jax.block_until_ready(out)

    ref = dsnet_reference(x, dw_weight, pw_weight, padding=PAD)
    assert out.shape == (B, NOUT, H, W), out.shape
    assert jnp.allclose(out, ref, atol=1e-4, rtol=1e-4), (
        float(jnp.max(jnp.abs(out - ref))))

    print("KERNEL_OK")
</pallas_src>

<mosaic_0001>
module attributes {stable_mosaic.version = 11 : i64} {
  func.func @_dsnet_kernel(%arg0: i32, %arg1: memref<8x256xf32, #tpu.memory_space<vmem>>, %arg2: memref<9x8x256xf32, #tpu.memory_space<vmem>>, %arg3: memref<16x8xf32, #tpu.memory_space<vmem>>, %arg4: memref<16x256xf32, #tpu.memory_space<vmem>>) attributes {dimension_semantics = [#tpu.dimension_semantics<arbitrary>], iteration_bounds = array<i64: 1>, scalar_prefetch = 0 : i64, scratch_operands = 0 : i64, tpu.core_type = #tpu.core_type<tc>, window_params = [{pipeline_mode = #tpu.pipeline_mode<synchronous>, transform_indices = @transform_0, window_bounds = array<i64: 8, 256>}, {pipeline_mode = #tpu.pipeline_mode<synchronous>, transform_indices = @transform_1, window_bounds = array<i64: 9, 8, 256>}, {pipeline_mode = #tpu.pipeline_mode<synchronous>, transform_indices = @transform_2, window_bounds = array<i64: 16, 8>}, {pipeline_mode = #tpu.pipeline_mode<synchronous>, transform_indices = @transform_3, window_bounds = array<i64: 16, 256>}]} {
    %c0 = arith.constant 0 : index
    %c0_0 = arith.constant 0 : index
    %0 = vector.load %arg1[%c0, %c0_0] : memref<8x256xf32, #tpu.memory_space<vmem>>, vector<8x256xf32>
    %c4 = arith.constant 4 : index
    %c0_1 = arith.constant 0 : index
    %c0_2 = arith.constant 0 : index
    %1 = vector.load %arg2[%c4, %c0_1, %c0_2] : memref<9x8x256xf32, #tpu.memory_space<vmem>>, vector<1x8x256xf32>
    %2 = vector.shape_cast %1 : vector<1x8x256xf32> to vector<8x256xf32>
    %3 = arith.mulf %0, %2 : vector<8x256xf32>
    %c17_i32 = arith.constant 17 : i32
    %4 = tpu.dynamic_rotate %0 by %c17_i32 dim 1 : vector<8x256xf32>, i32 -> vector<8x256xf32>
    %c0_3 = arith.constant 0 : index
    %c0_4 = arith.constant 0 : index
    %c0_5 = arith.constant 0 : index
    %5 = vector.load %arg2[%c0_3, %c0_4, %c0_5] : memref<9x8x256xf32, #tpu.memory_space<vmem>>, vector<1x8x256xf32>
    %6 = vector.shape_cast %5 : vector<1x8x256xf32> to vector<8x256xf32>
    %7 = arith.mulf %4, %6 : vector<8x256xf32>
    %8 = arith.addf %3, %7 : vector<8x256xf32>
    %c16_i32 = arith.constant 16 : i32
    %9 = tpu.dynamic_rotate %0 by %c16_i32 dim 1 : vector<8x256xf32>, i32 -> vector<8x256xf32>
    %c1 = arith.constant 1 : index
    %c0_6 = arith.constant 0 : index
    %c0_7 = arith.constant 0 : index
    %10 = vector.load %arg2[%c1, %c0_6, %c0_7] : memref<9x8x256xf32, #tpu.memory_space<vmem>>, vector<1x8x256xf32>
    %11 = vector.shape_cast %10 : vector<1x8x256xf32> to vector<8x256xf32>
    %12 = arith.mulf %9, %11 : vector<8x256xf32>
    %13 = arith.addf %8, %12 : vector<8x256xf32>
    %c15_i32 = arith.constant 15 : i32
    %14 = tpu.dynamic_rotate %0 by %c15_i32 dim 1 : vector<8x256xf32>, i32 -> vector<8x256xf32>
    %c2 = arith.constant 2 : index
    %c0_8 = arith.constant 0 : index
    %c0_9 = arith.constant 0 : index
    %15 = vector.load %arg2[%c2, %c0_8, %c0_9] : memref<9x8x256xf32, #tpu.memory_space<vmem>>, vector<1x8x256xf32>
    %16 = vector.shape_cast %15 : vector<1x8x256xf32> to vector<8x256xf32>
    %17 = arith.mulf %14, %16 : vector<8x256xf32>
    %18 = arith.addf %13, %17 : vector<8x256xf32>
    %c1_i32 = arith.constant 1 : i32
    %19 = tpu.dynamic_rotate %0 by %c1_i32 dim 1 : vector<8x256xf32>, i32 -> vector<8x256xf32>
    %c3 = arith.constant 3 : index
    %c0_10 = arith.constant 0 : index
    %c0_11 = arith.constant 0 : index
    %20 = vector.load %arg2[%c3, %c0_10, %c0_11] : memref<9x8x256xf32, #tpu.memory_space<vmem>>, vector<1x8x256xf32>
    %21 = vector.shape_cast %20 : vector<1x8x256xf32> to vector<8x256xf32>
    %22 = arith.mulf %19, %21 : vector<8x256xf32>
    %23 = arith.addf %18, %22 : vector<8x256xf32>
    %c255_i32 = arith.constant 255 : i32
    %24 = tpu.dynamic_rotate %0 by %c255_i32 dim 1 : vector<8x256xf32>, i32 -> vector<8x256xf32>
    %c5 = arith.constant 5 : index
    %c0_12 = arith.constant 0 : index
    %c0_13 = arith.constant 0 : index
    %25 = vector.load %arg2[%c5, %c0_12, %c0_13] : memref<9x8x256xf32, #tpu.memory_space<vmem>>, vector<1x8x256xf32>
    %26 = vector.shape_cast %25 : vector<1x8x256xf32> to vector<8x256xf32>
    %27 = arith.mulf %24, %26 : vector<8x256xf32>
    %28 = arith.addf %23, %27 : vector<8x256xf32>
    %c241_i32 = arith.constant 241 : i32
    %29 = tpu.dynamic_rotate %0 by %c241_i32 dim 1 : vector<8x256xf32>, i32 -> vector<8x256xf32>
    %c6 = arith.constant 6 : index
    %c0_14 = arith.constant 0 : index
    %c0_15 = arith.constant 0 : index
    %30 = vector.load %arg2[%c6, %c0_14, %c0_15] : memref<9x8x256xf32, #tpu.memory_space<vmem>>, vector<1x8x256xf32>
    %31 = vector.shape_cast %30 : vector<1x8x256xf32> to vector<8x256xf32>
    %32 = arith.mulf %29, %31 : vector<8x256xf32>
    %33 = arith.addf %28, %32 : vector<8x256xf32>
    %c240_i32 = arith.constant 240 : i32
    %34 = tpu.dynamic_rotate %0 by %c240_i32 dim 1 : vector<8x256xf32>, i32 -> vector<8x256xf32>
    %c7 = arith.constant 7 : index
    %c0_16 = arith.constant 0 : index
    %c0_17 = arith.constant 0 : index
    %35 = vector.load %arg2[%c7, %c0_16, %c0_17] : memref<9x8x256xf32, #tpu.memory_space<vmem>>, vector<1x8x256xf32>
    %36 = vector.shape_cast %35 : vector<1x8x256xf32> to vector<8x256xf32>
    %37 = arith.mulf %34, %36 : vector<8x256xf32>
    %38 = arith.addf %33, %37 : vector<8x256xf32>
    %c239_i32 = arith.constant 239 : i32
    %39 = tpu.dynamic_rotate %0 by %c239_i32 dim 1 : vector<8x256xf32>, i32 -> vector<8x256xf32>
    %c8 = arith.constant 8 : index
    %c0_18 = arith.constant 0 : index
    %c0_19 = arith.constant 0 : index
    %40 = vector.load %arg2[%c8, %c0_18, %c0_19] : memref<9x8x256xf32, #tpu.memory_space<vmem>>, vector<1x8x256xf32>
    %41 = vector.shape_cast %40 : vector<1x8x256xf32> to vector<8x256xf32>
    %42 = arith.mulf %39, %41 : vector<8x256xf32>
    %43 = arith.addf %38, %42 : vector<8x256xf32>
    %c0_20 = arith.constant 0 : index
    %c0_21 = arith.constant 0 : index
    %44 = vector.load %arg3[%c0_20, %c0_21] : memref<16x8xf32, #tpu.memory_space<vmem>>, vector<16x8xf32>
    %cst = arith.constant dense<0.000000e+00> : vector<16x256xf32>
    %45 = tpu.matmul %44, %43, %cst {dimension_numbers = #tpu.dot_dimension_numbers<[1], [0], [0], [1], [0, 0, 1, 1], [], []>} : vector<16x8xf32>, vector<8x256xf32>, vector<16x256xf32> -> vector<16x256xf32>
    %c0_22 = arith.constant 0 : index
    %c0_23 = arith.constant 0 : index
    %46 = vector.load %arg4[%c0_22, %c0_23] : memref<16x256xf32, #tpu.memory_space<vmem>>, vector<16x256xf32>
    tpu.vector_store %arg4[%c0_22, %c0_23], %45 {strides = array<i32>} : memref<16x256xf32, #tpu.memory_space<vmem>>, vector<16x256xf32>,
    return
  }
  func.func @transform_0(%arg0: i32) -> (i32, i32) {
    %c0_i32 = arith.constant 0 : i32
    %c0_i32_0 = arith.constant 0 : i32
    %c0_i32_1 = arith.constant 0 : i32
    return %c0_i32, %c0_i32_0 : i32, i32
  }
  func.func @transform_1(%arg0: i32) -> (i32, i32, i32) {
    %c0_i32 = arith.constant 0 : i32
    %c0_i32_0 = arith.constant 0 : i32
    %c0_i32_1 = arith.constant 0 : i32
    %c0_i32_2 = arith.constant 0 : i32
    return %c0_i32, %c0_i32_0, %c0_i32_1 : i32, i32, i32
  }
  func.func @transform_2(%arg0: i32) -> (i32, i32) {
    %c0_i32 = arith.constant 0 : i32
    %c0_i32_0 = arith.constant 0 : i32
    %c0_i32_1 = arith.constant 0 : i32
    return %c0_i32, %c0_i32_0 : i32, i32
  }
  func.func @transform_3(%arg0: i32) -> (i32, i32) {
    %c0_i32 = arith.constant 0 : i32
    %c0_i32_0 = arith.constant 0 : i32
    %c0_i32_1 = arith.constant 0 : i32
    return %c0_i32, %c0_i32_0 : i32, i32
  }
}

</mosaic_0001>

<bundles_post_ra>
// kernel: tpu_custom_call.1
= control target key start
LH: loop header
LB: loop body
LE: loop exit
PB: predicated region body
PF: predicated region fallthrough
CT: control target
= control target key end

     0   :  { %8 = vsyncpa [#allocation3], 0  ;;  %s410_s0 = inlined_call_operand.vmem [shape: f32[8,256], index: 0, kind: input, shape index: {}]   ;;  %s411_s1 = inlined_call_operand.hbm [shape: f32[9,8,256], index: 1, kind: input, shape index: {}]   ;;  %s412_s2 = inlined_call_operand.vmem [shape: f32[16,8], index: 2, kind: input, shape index: {}]   ;;  %s413_s3 = inlined_call_operand.hbm [shape: f32[16,256], index: 3, kind: output, shape index: {}]  }
   0x1   :  { %9 = vsyncpa [#allocation4], 0  ;;  %s320_s12 = smov [#allocation2]   ;;  %s272_s16 = scalar_lea.hbm %s411_s1, 2304 }
   0x2   :  { %s17_s13 = sshll.u32 %s320_s12, 4  ;;  %p273_p0 = scmp.ne.s32.totalorder %s411_s1, %s272_s16  ;;  %s18_s13 = int_to_ptr.vmem [resolvable:$true] %s17_s13 }
   0x3   :  { %p276_p1 = scmp.lt.u32.totalorder %s272_s16, %s411_s1 }
   0x5   :  { %p278_p2 = pnand %p276_p1, %p273_p0 }
   0x7   :  { %281 = shalt.err (!%p278_p2)
}
   0x8   :  { %s282_s21 = scalar_lea.vmem %s18_s13, 2304  ;;  %p287_p4 = scmp.lt.s32.totalorder %s18_s13, %s18_s13 }
   0x9   :  { %p283_p3 = scmp.ne.s32.totalorder %s18_s13, %s282_s21  ;;  %p288_p5 = scmp.lt.s32.totalorder %s282_s21, %s282_s21 }
   0xb   :  { %p289_p6 = por %p288_p5, %p287_p4 }
   0xd   :  { %p290_p7 = pnand %p289_p6, %p283_p3 }
   0xf   :  { %293 = shalt.err (!%p290_p7)
}
  0x10   :  { %s321_s22 = smov 256   ;;  %s322_s23 = smov 16  }
  0x11   :  { %23 = dma.hbm_to_vmem [thread:$0]  %s411_s1, 2304, %s18_s13, [#allocation3], %s321_s22, %s321_s22, %s322_s23  }
  0x12   :  { %316 = dma.done.wait [#allocation3], 2304  }
  0x13   :  { %317 = vsyncadd [#allocation3], 4294964992  ;;  %v29_v0 = vld [vmem:[%s410_s0] sm:$0xff]  ;;  %s323_s28 = smov 17   ;;  %v30_v1 = vld [vmem:[%s410_s0 + $0x8] sm:$0xff]  ;;  %s324_s4 = smov 15   ;;  %v40_v3 = vlaneseq }
  0x14   :  { %51 = vrot.lane.b32.xlu1 %v29_v0, %s322_s23  ;;  %36 = vrot.lane.b32.xlu0 %v29_v0, %s323_s28  ;;  %s325_s1 = smov 1   ;;  %s326_s5 = smov 127   ;;  %v328_v2 = vmov 0.0   ;;  %v32_v9 = vld [vmem:[#allocation2 + $0x40] sm:$0xff]  ;;  %v33_v10 = vld [vmem:[#allocation2 + $0x48] sm:$0xff]  ;;  %v59_v23 = vld [vmem:[#allocation2 + $0x10] sm:$0xff] }
  0x15   :  { %s327_s6 = smov 113   ;;  %222 = vmatprep.mubr.f32.mxu0 %v328_v2  ;;  %228 = vmatprep.mubr.f32.mxu1 %v328_v2  ;;  %s329_s7 = smov 112   ;;  %v375_v6 = vand.u32 127, %v40_v3  ;;  %v45_v11 = vld [vmem:[#allocation2] sm:$0xff]  ;;  %v46_v12 = vld [vmem:[#allocation2 + $0x8] sm:$0xff]  ;;  %v35_v17 = vmul.f32 %v33_v10, %v30_v1  ;;  %v34_v18 = vmul.f32 %v32_v9, %v29_v0  ;;  %v60_v24 = vld [vmem:[#allocation2 + $0x18] sm:$0xff] }
  0x16   :  { %s330_s0 = smov 111   ;;  %v73_v29 = vld [vmem:[#allocation2 + $0x20] sm:$0xff]  ;;  %v74_v30 = vld [vmem:[#allocation2 + $0x28] sm:$0xff]  ;;  %v87_v37 = vld [vmem:[#allocation2 + $0x30] sm:$0xff]  ;;  %vm151_vm8 = vcmask 64512   ;;  %s331_s12 = smov [#allocation5]  }
  0x17   :  { %vm42_vm0 = vcmp.lt.s32.totalorder %v375_v6, 17  ;;  %vm55_vm1 = vcmp.lt.s32.totalorder %v375_v6, 16  ;;  %vm69_vm2 = vcmp.lt.s32.totalorder %v375_v6, 15  ;;  %vm83_vm3 = vcmp.lt.s32.totalorder %v375_v6, 1  ;;  %v88_v38 = vld [vmem:[#allocation2 + $0x38] sm:$0xff]  ;;  %v101_v45 = vld [vmem:[#allocation2 + $0x50] sm:$0xff] }
  0x18   :  { %53 = vrot.lane.b32.xlu1 %v30_v1, %s322_s23  ;;  %38 = vrot.lane.b32.xlu0 %v30_v1, %s323_s28  ;;  %vm97_vm4 = vcmp.lt.s32.totalorder %v375_v6, 127  ;;  %vm111_vm5 = vcmp.lt.s32.totalorder %v375_v6, 113  ;;  %v102_v46 = vld [vmem:[#allocation2 + $0x58] sm:$0xff]  ;;  %v115_v53 = vld [vmem:[#allocation2 + $0x60] sm:$0xff]  ;;  %v116_v54 = vld [vmem:[#allocation2 + $0x68] sm:$0xff]  ;;  %vm125_vm6 = vcmp.lt.s32.totalorder %v375_v6, 112 }
  0x19   :  { %v129_v61 = vld [vmem:[#allocation2 + $0x70] sm:$0xff]  ;;  %v130_v62 = vld [vmem:[#allocation2 + $0x78] sm:$0xff]  ;;  %vm139_vm7 = vcmp.lt.s32.totalorder %v375_v6, 111  ;;  %v149_v6 = vld [vmem:[%s412_s2] sm:$0xff]  ;;  %s244_s13 = sshll.u32 %s331_s12, 4  ;;  %s245_s13 = int_to_ptr.vmem [resolvable:$true] %s244_s13 }
  0x1a   :  { %s294_s14 = scalar_lea.vmem %s245_s13, 512  ;;  %p299_p9 = scmp.lt.s32.totalorder %s245_s13, %s245_s13 }
  0x1b   :  { %p295_p8 = scmp.ne.s32.totalorder %s245_s13, %s294_s14  ;;  %p300_p10 = scmp.lt.s32.totalorder %s294_s14, %s294_s14 }
  0x1c   :  { %67 = vrot.lane.b32.xlu1 %v30_v1, %s324_s4  ;;  %65 = vrot.lane.b32.xlu0 %v29_v0, %s324_s4 }
  0x1d   :  { %p301_p11 = por %p300_p10, %p299_p9 }
  0x1f   :  { %p302_p12 = pnand %p301_p11, %p295_p8 }
  0x20   :  { %81 = vrot.lane.b32.xlu1 %v30_v1, %s325_s1  ;;  %79 = vrot.lane.b32.xlu0 %v29_v0, %s325_s1 }
  0x24   :  { %95 = vrot.lane.b32.xlu1 %v30_v1, %s326_s5  ;;  %93 = vrot.lane.b32.xlu0 %v29_v0, %s326_s5 }
  0x28   :  { %109 = vrot.lane.b32.xlu1 %v30_v1, %s327_s6  ;;  %107 = vrot.lane.b32.xlu0 %v29_v0, %s327_s6 }
  0x2c   :  { %123 = vrot.lane.b32.xlu1 %v30_v1, %s329_s7  ;;  %121 = vrot.lane.b32.xlu0 %v29_v0, %s329_s7 }
  0x30   :  { %137 = vrot.lane.b32.xlu1 %v30_v1, %s330_s0  ;;  %135 = vrot.lane.b32.xlu0 %v29_v0, %s330_s0 }
  0x86   :  { %v52_v4 = vpop.permute.xlu1 %51  ;;  %v37_v5 = vpop.permute.xlu0 %36 }
  0x8a   :  { %v54_v7 = vpop.permute.xlu1 %53  ;;  %v39_v8 = vpop.permute.xlu0 %38 }
  0x8b   :  { %v43_v13 = vsel %vm42_vm0, %v37_v5, %v39_v8  ;;  %v44_v14 = vsel %vm42_vm0, %v39_v8, %v37_v5  ;;  %v56_v25 = vsel %vm55_vm1, %v52_v4, %v54_v7  ;;  %v57_v26 = vsel %vm55_vm1, %v54_v7, %v52_v4 }
  0x8c   :  { %v47_v19 = vmul.f32 %v45_v11, %v44_v14  ;;  %v48_v20 = vmul.f32 %v46_v12, %v43_v13  ;;  %v61_v33 = vmul.f32 %v59_v23, %v57_v26  ;;  %v62_v34 = vmul.f32 %v60_v24, %v56_v25  ;;  %v143_v12 = vld [vmem:[#allocation2 + $0x80] sm:$0xff]  ;;  %v144_v13 = vld [vmem:[#allocation2 + $0x88] sm:$0xff] }
  0x8d   :  { %v150_v26 = vld [vmem:[%s412_s2 + $0x8] sm:$0xff] }
  0x8e   :  { %v68_v15 = vpop.permute.xlu1 %67  ;;  %v66_v16 = vpop.permute.xlu0 %65  ;;  %v49_v27 = vadd.f32 %v47_v19, %v34_v18  ;;  %v50_v28 = vadd.f32 %v48_v20, %v35_v17 }
  0x8f   :  { %v70_v31 = vsel %vm69_vm2, %v66_v16, %v68_v15  ;;  %v71_v32 = vsel %vm69_vm2, %v68_v15, %v66_v16 }
  0x90   :  { %v64_v41 = vadd.f32 %v62_v34, %v50_v28  ;;  %v63_v42 = vadd.f32 %v61_v33, %v49_v27  ;;  %v75_v43 = vmul.f32 %v73_v29, %v71_v32  ;;  %v76_v44 = vmul.f32 %v74_v30, %v70_v31 }
  0x92   :  { %v82_v21 = vpop.permute.xlu1 %81  ;;  %v80_v22 = vpop.permute.xlu0 %79  ;;  %v77_v57 = vadd.f32 %v75_v43, %v63_v42  ;;  %v78_v58 = vadd.f32 %v76_v44, %v64_v41 }
  0x93   :  { %v84_v39 = vsel %vm83_vm3, %v80_v22, %v82_v21  ;;  %v85_v40 = vsel %vm83_vm3, %v82_v21, %v80_v22 }
  0x94   :  { %v89_v49 = vmul.f32 %v87_v37, %v85_v40  ;;  %v90_v50 = vmul.f32 %v88_v38, %v84_v39 }
  0x96   :  { %v96_v35 = vpop.permute.xlu1 %95  ;;  %v94_v36 = vpop.permute.xlu0 %93  ;;  %v91_v63 = vadd.f32 %v89_v49, %v77_v57  ;;  %v92_v0 = vadd.f32 %v90_v50, %v78_v58 }
  0x97   :  { %v98_v47 = vsel %vm97_vm4, %v94_v36, %v96_v35  ;;  %v99_v48 = vsel %vm97_vm4, %v96_v35, %v94_v36 }
  0x98   :  { %v103_v59 = vmul.f32 %v101_v45, %v98_v47  ;;  %v104_v60 = vmul.f32 %v102_v46, %v99_v48 }
  0x9a   :  { %v110_v51 = vpop.permute.xlu1 %109  ;;  %v108_v52 = vpop.permute.xlu0 %107  ;;  %v105_v8 = vadd.f32 %v103_v59, %v91_v63  ;;  %v106_v9 = vadd.f32 %v104_v60, %v92_v0 }
  0x9b   :  { %v112_v55 = vsel %vm111_vm5, %v108_v52, %v110_v51  ;;  %v113_v56 = vsel %vm111_vm5, %v110_v51, %v108_v52 }
  0x9c   :  { %v117_v1 = vmul.f32 %v115_v53, %v112_v55  ;;  %v118_v2 = vmul.f32 %v116_v54, %v113_v56 }
  0x9e   :  { %v124_v3 = vpop.permute.xlu1 %123  ;;  %v122_v4 = vpop.permute.xlu0 %121  ;;  %v119_v14 = vadd.f32 %v117_v1, %v105_v8  ;;  %v120_v15 = vadd.f32 %v118_v2, %v106_v9 }
  0x9f   :  { %v126_v5 = vsel %vm125_vm6, %v122_v4, %v124_v3  ;;  %v127_v7 = vsel %vm125_vm6, %v124_v3, %v122_v4 }
  0xa0   :  { %v131_v10 = vmul.f32 %v129_v61, %v126_v5  ;;  %v132_v11 = vmul.f32 %v130_v62, %v127_v7 }
  0xa2   :  { %v138_v16 = vpop.permute.xlu1 %137  ;;  %v136_v17 = vpop.permute.xlu0 %135  ;;  %v134_v22 = vadd.f32 %v132_v11, %v120_v15  ;;  %v133_v23 = vadd.f32 %v131_v10, %v119_v14 }
  0xa3   :  { %v140_v18 = vsel %vm139_vm7, %v136_v17, %v138_v16  ;;  %v141_v19 = vsel %vm139_vm7, %v138_v16, %v136_v17 }
  0xa4   :  { %v145_v20 = vmul.f32 %v143_v12, %v140_v18  ;;  %v146_v21 = vmul.f32 %v144_v13, %v141_v19 }
  0xa6   :  { %v148_v24 = vadd.f32 %v146_v21, %v134_v22  ;;  %v147_v25 = vadd.f32 %v145_v20, %v133_v23 }
  0xa8   :  { %158 = vmatprep.subr.mxu0 %v148_v24  ;;  %258 = vmatprep.subr.mxu1 %v148_v24 }
  0xa9   :  { %159 = vmatpush1.msra.mxu0 %v147_v25  ;;  %259 = vmatpush1.msra.mxu1 %v147_v25 }
  0xaa   :  { %256 = vmatmul.mubr.msk.f32.vlgmr.msra.gmra.mrb[0].mxu0 %vm151_vm8, %v149_v6  ;;  %257 = vmatmul.mubr.msk.f32.vlgmr.msra.gmra.mrb[0].mxu1 %vm151_vm8, %v150_v26 }
 0x17d   :  { %v224_v27 = vpop.f32.mrb[0].mxu0  ;;  %v230_v28 = vpop.f32.mrb[0].mxu1 }
 0x17e   :  { %235 = vst [vmem:[#allocation5] sm:$0xff] %v224_v27  ;;  %237 = vst [vmem:[#allocation5 + $0x10] sm:$0xff] %v230_v28  ;;  %v226_v29 = vpop.f32.mrb[1].mxu0  ;;  %v232_v30 = vpop.f32.mrb[1].mxu1 }
 0x17f   :  { %236 = vst [vmem:[#allocation5 + $0x8] sm:$0xff] %v226_v29  ;;  %238 = vst [vmem:[#allocation5 + $0x18] sm:$0xff] %v232_v30 }
 0x180   :  { %305 = shalt.err (!%p302_p12)
}
 0x181   :  { %s306_s16 = scalar_lea.hbm %s413_s3, 512 }
 0x182   :  { %p307_p13 = scmp.ne.s32.totalorder %s413_s3, %s306_s16  ;;  %p310_p0 = scmp.lt.u32.totalorder %s306_s16, %s413_s3 }
 0x184   :  { %p312_p1 = pnand %p310_p0, %p307_p13 }
 0x186   :  { %315 = shalt.err (!%p312_p1)
}
 0x187   :  { %250 = dma.vmem_to_hbm [thread:$0]  %s245_s13, 512, %s413_s3, [#allocation4], %s321_s22, %s321_s22, %s322_s23  }
 0x188   :  { %318 = dma.done.wait [#allocation4], 512  }
 0x189   :  { %319 = vsyncadd [#allocation4], 4294966784 }
 0x18a   :  { %254 = vsyncpa [#allocation3], 1 }
 0x18b   :  { %255 = vsyncpa [#allocation4], 1 }

</bundles_post_ra>
